<compile_context>
chip_gen: v6e
topology: v6e:2x2x1
jax: 0.10.0
libtpu: 0.0.40
codegen_flags: <defaults>
</compile_context>

<pallas_src>
import functools

import jax
import jax.numpy as jnp
from jax.experimental import pallas as pl
from jax.experimental.pallas import tpu as pltpu

LANE = 128      # vreg lane width — weight output dims padded to multiples of this
SUBLANE = 8     # f32 sublane count


def _round_up(n, m):
    return ((n + m - 1) // m) * m


def _sublane_granule(dtype):
    """Second-minor tiling granule for a dtype (8 for f32, 16 for bf16, 32 for int8)."""
    return max(SUBLANE, (4 * SUBLANE) // jnp.dtype(dtype).itemsize)


# ----------------------------------------------------------------------------
# Parameter / mask construction (glue, plain JAX)
# ----------------------------------------------------------------------------

def _linear_init(key, fan_in, fan_out):
    """Deterministic init mimicking torch.nn.Linear (uniform +/- 1/sqrt(fan_in))."""
    kw, kb = jax.random.split(key)
    bound = 1.0 / jnp.sqrt(jnp.asarray(fan_in, jnp.float32))
    w = jax.random.uniform(kw, (fan_out, fan_in), jnp.float32, -bound, bound)  # [out, in]
    b = jax.random.uniform(kb, (fan_out,), jnp.float32, -bound, bound)
    return w, b


def build_ar_mlp_params(key, num_input_channels, hidden_channels, num_output_heads):
    """Masked-linear layer params matching AutoregressiveMLP.__init__ exactly.

    Returns a list of (masked_weight_T [in, out], bias [1, out]) in f32.
    """
    D = num_input_channels
    assert D >= 2
    assert all(D <= h for h in hidden_channels)

    prev_degrees = jnp.arange(1, D + 1, dtype=jnp.int32)
    layers = []
    keys = jax.random.split(key, len(hidden_channels) + 1)

    for i, h in enumerate(hidden_channels):
        degrees = jnp.arange(h, dtype=jnp.int32) % (D - 1) + 1
        w, b = _linear_init(keys[i], prev_degrees.shape[0], h)
        mask = (degrees[:, None] >= prev_degrees[None, :]).astype(w.dtype)  # [out, in]
        layers.append(((mask * w).T, b[None, :]))                           # [in, out], [1, out]
        prev_degrees = degrees

    out_degrees = jnp.tile(jnp.arange(D, dtype=jnp.int32), num_output_heads)
    w, b = _linear_init(keys[-1], prev_degrees.shape[0], D * num_output_heads)
    mask = (out_degrees[:, None] >= prev_degrees[None, :]).astype(w.dtype)
    layers.append(((mask * w).T, b[None, :]))
    return layers


def _pad_layers(layers, operand_dtype):
    """Pad each layer's output (N) dim to a multiple of LANE; K follows the
    previous layer's padded N (layer 0's K stays at the native channel dim D,
    because x is streamed unpadded).  Weights cast to operand_dtype, biases f32."""
    padded = []
    k_pad = layers[0][0].shape[0]           # = D, unpadded
    for w, b in layers:
        k, n = w.shape
        n_pad = _round_up(n, LANE)
        wp = jnp.pad(w, ((0, k_pad - k), (0, n_pad - n))).astype(operand_dtype)
        bp = jnp.pad(b, ((0, 0), (0, n_pad - n))).astype(jnp.float32)
        padded.append((wp, bp))
        k_pad = n_pad
    return padded


# ----------------------------------------------------------------------------
# Pallas kernel: full MLP forward (matmul + bias + tanh chain) on one batch tile
# ----------------------------------------------------------------------------

def _ar_mlp_kernel(num_hidden_layers, operand_dtype, *refs):
    # refs = (x_ref, w0, b0, w1, b1, ..., wL, bL, out_ref)
    x_ref = refs[0]
    out_ref = refs[-1]
    param_refs = refs[1:-1]

    h = x_ref[...]  # activations for this batch tile, already in operand_dtype
    for i in range(num_hidden_layers + 1):
        w_ref = param_refs[2 * i]
        b_ref = param_refs[2 * i + 1]
        # MXU matmul in operand_dtype with f32 accumulation.
        acc = jnp.dot(h, w_ref[...], preferred_element_type=jnp.float32)
        acc = acc + b_ref[...]                      # f32 bias-add
        if i < num_hidden_layers:
            # tanh in f32 (EUP), then keep the inter-layer activation in the
            # matmul operand dtype (halves the live VMEM slab when bf16).
            h = jnp.tanh(acc).astype(operand_dtype)
        else:
            h = acc
    out_ref[...] = h.astype(out_ref.dtype)


def autoregressive_mlp_forward(x, layers, num_output_heads, *,
                               tile_b=512,
                               operand_dtype=jnp.bfloat16,
                               out_dtype=jnp.float32):
    """x: [B, D] float32 -> [B, num_output_heads, D] in out_dtype."""
    B, D = x.shape
    out_dim = layers[-1][0].shape[1]
    assert out_dim == D * num_output_heads
    num_hidden_layers = len(layers) - 1

    # ---- pad weight N dims to lane width; cast matmul operands --------------
    padded_layers = _pad_layers(layers, operand_dtype)
    out_pad = padded_layers[-1][0].shape[1]

    flat_params = []
    for w, b in padded_layers:
        flat_params.extend([w, b])

    op_itemsize = jnp.dtype(operand_dtype).itemsize
    out_itemsize = jnp.dtype(out_dtype).itemsize
    weight_bytes = sum(int(p.size) * p.dtype.itemsize for p in flat_params)
    max_n = max(int(w.shape[1]) for w, _ in padded_layers)

    def vmem_estimate(tb):
        # resident (single-buffered) weights + double-buffered x/out tiles
        # + live intermediate activation slabs (f32 acc + operand-dtype h).
        io_bytes = 2 * tb * D * op_itemsize + 2 * tb * out_pad * out_itemsize
        inter_bytes = tb * max_n * (4 + op_itemsize)
        return weight_bytes + io_bytes + inter_bytes

    try:
        phys_vmem = int(pltpu.get_tpu_info().vmem_capacity_bytes)
    except Exception:
        phys_vmem = 64 << 20            # conservative: v7x per-TensorCore VMEM
    vmem_budget = int(phys_vmem * 0.70)

    # ---- batch tiling (grid axis, "parallel") --------------------------------
    g = max(_sublane_granule(operand_dtype), _sublane_granule(out_dtype))
    tile_b = max(g, min(_round_up(tile_b, g), _round_up(B, g)))
    b_round = _round_up(B, g)
    if b_round >= 2 * g and _round_up(B, tile_b) // tile_b < 2:
        # v7x has 2 TensorCores: keep >= 2 grid steps so the "parallel" axis shards.
        tile_b = _round_up((b_round + 1) // 2, g)
    while tile_b > g and vmem_estimate(tile_b) > vmem_budget:
        tile_b = max(g, _round_up(tile_b // 2, g))
    # TODO(synk): if vmem_estimate(g) still exceeds the budget (very wide hidden
    # layers on v7x's 64 MiB VMEM), tile the hidden/N dim with an extra
    # "arbitrary" grid axis + accumulator instead of keeping all weights resident.

    b_pad = _round_up(B, tile_b)
    num_tiles = b_pad // tile_b

    # Stream x in operand_dtype (halves the recurring HBM read for bf16).
    x_p = jnp.pad(x, ((0, b_pad - B), (0, 0))).astype(operand_dtype)

    vmem_limit = int(min(phys_vmem - (4 << 20),
                         max(int(1.3 * vmem_estimate(tile_b)), 32 << 20)))

    # Advisory cost estimate for XLA scheduling.
    flops = 2 * b_pad * sum(int(w.shape[0]) * int(w.shape[1]) for w, _ in padded_layers)
    transcendentals = b_pad * sum(int(w.shape[1]) for w, _ in padded_layers[:-1])
    bytes_accessed = (b_pad * D * op_itemsize + weight_bytes
                      + b_pad * out_pad * out_itemsize)

    kernel = functools.partial(_ar_mlp_kernel, num_hidden_layers, operand_dtype)
    out_specs = pl.BlockSpec((tile_b, out_pad), lambda i: (i, 0))

    def _call(weight_pipeline_mode):
        extra = ({} if weight_pipeline_mode is None
                 else {"pipeline_mode": weight_pipeline_mode})
        # x/out tile over batch; weights & biases are VMEM-resident (constant map).
        in_specs = [pl.BlockSpec((tile_b, D), lambda i: (i, 0))]
        for p in flat_params:
            in_specs.append(pl.BlockSpec(p.shape, lambda i: (0, 0), **extra))
        return pl.pallas_call(
            kernel,
            out_shape=jax.ShapeDtypeStruct((b_pad, out_pad), out_dtype),
            grid=(num_tiles,),
            in_specs=in_specs,
            out_specs=out_specs,
            compiler_params=pltpu.CompilerParams(
                dimension_semantics=("parallel",),
                vmem_limit_bytes=vmem_limit),
            cost_estimate=pl.CostEstimate(
                flops=flops,
                transcendentals=transcendentals,
                bytes_accessed=bytes_accessed),
        )(x_p, *flat_params)

    try:
        # Weights never change across grid steps -> single-buffer them
        # (halves their VMEM footprint vs default double buffering).
        flat_out = _call(pl.Buffered(1))
    except Exception:
        # pipeline_mode=pl.Buffered(1) unsupported by this jax version; the
        # default double-buffered path is functionally identical.
        flat_out = _call(None)

    # Un-pad + reshape in the wrapper (cheap layout plumbing; kernel stores stay
    # lane-dense).
    return flat_out[:B, :out_dim].reshape(B, num_output_heads, D)


# ----------------------------------------------------------------------------
# Pure-JAX reference for a sanity check
# ----------------------------------------------------------------------------

def _reference_forward(x, layers, num_output_heads):
    h = x
    for w, b in layers[:-1]:
        h = jnp.tanh(h @ w + b)
    w, b = layers[-1]
    out = h @ w + b
    return out.reshape(x.shape[0], num_output_heads, x.shape[1])


if __name__ == "__main__":
    # Small shapes consistent with the module's forward: inputs [B, num_input_channels]
    B = 2
    num_input_channels = 4
    hidden_channels = [32, 32]
    num_output_heads = 3

    key = jax.random.PRNGKey(0)
    kx, kp = jax.random.split(key)

    x = jax.random.normal(kx, (B, num_input_channels), dtype=jnp.float32)
    layers = build_ar_mlp_params(kp, num_input_channels, hidden_channels,
                                 num_output_heads)

    ref = _reference_forward(x, layers, num_output_heads)

    # f32 operand / f32 output path: exact structural check against the reference.
    out_f32 = autoregressive_mlp_forward(x, layers, num_output_heads,
                                         operand_dtype=jnp.float32,
                                         out_dtype=jnp.float32)
    out_f32 = jax.block_until_ready(out_f32)
    assert out_f32.shape == (B, num_output_heads, num_input_channels)
    assert jnp.allclose(out_f32, ref, atol=1e-5, rtol=1e-5)

    # bf16 operand / bf16 output fast path (v6e/v7x): looser tolerance.
    out_bf16 = autoregressive_mlp_forward(x, layers, num_output_heads,
                                          operand_dtype=jnp.bfloat16,
                                          out_dtype=jnp.bfloat16)
    out_bf16 = jax.block_until_ready(out_bf16)
    assert out_bf16.shape == (B, num_output_heads, num_input_channels)
    assert jnp.allclose(out_bf16.astype(jnp.float32), ref, atol=5e-2, rtol=5e-2)

    print("KERNEL_OK")
</pallas_src>

<mosaic_0001>
module attributes {stable_mosaic.version = 11 : i64} {
  func.func @_ar_mlp_kernel(%arg0: i32, %arg1: memref<8x4xf32, #tpu.memory_space<vmem>>, %arg2: memref<4x128xf32, #tpu.memory_space<vmem>>, %arg3: memref<1x128xf32, #tpu.memory_space<vmem>>, %arg4: memref<128x128xf32, #tpu.memory_space<vmem>>, %arg5: memref<1x128xf32, #tpu.memory_space<vmem>>, %arg6: memref<128x128xf32, #tpu.memory_space<vmem>>, %arg7: memref<1x128xf32, #tpu.memory_space<vmem>>, %arg8: memref<8x128xf32, #tpu.memory_space<vmem>>) attributes {dimension_semantics = [#tpu.dimension_semantics<parallel>], iteration_bounds = array<i64: 1>, scalar_prefetch = 0 : i64, scratch_operands = 0 : i64, tpu.core_type = #tpu.core_type<tc>, window_params = [{transform_indices = @transform_0, window_bounds = array<i64: 8, 4>}, {pipeline_mode = #tpu.pipeline_mode<synchronous>, transform_indices = @transform_1, window_bounds = array<i64: 4, 128>}, {pipeline_mode = #tpu.pipeline_mode<synchronous>, transform_indices = @transform_2, window_bounds = array<i64: 1, 128>}, {pipeline_mode = #tpu.pipeline_mode<synchronous>, transform_indices = @transform_3, window_bounds = array<i64: 128, 128>}, {pipeline_mode = #tpu.pipeline_mode<synchronous>, transform_indices = @transform_4, window_bounds = array<i64: 1, 128>}, {pipeline_mode = #tpu.pipeline_mode<synchronous>, transform_indices = @transform_5, window_bounds = array<i64: 128, 128>}, {pipeline_mode = #tpu.pipeline_mode<synchronous>, transform_indices = @transform_6, window_bounds = array<i64: 1, 128>}, {transform_indices = @transform_7, window_bounds = array<i64: 8, 128>}]} {
    %c0 = arith.constant 0 : index
    %c0_0 = arith.constant 0 : index
    %0 = vector.load %arg1[%c0, %c0_0] : memref<8x4xf32, #tpu.memory_space<vmem>>, vector<8x4xf32>
    %c0_1 = arith.constant 0 : index
    %c0_2 = arith.constant 0 : index
    %1 = vector.load %arg2[%c0_1, %c0_2] : memref<4x128xf32, #tpu.memory_space<vmem>>, vector<4x128xf32>
    %cst = arith.constant dense<0.000000e+00> : vector<8x128xf32>
    %2 = tpu.matmul %0, %1, %cst {dimension_numbers = #tpu.dot_dimension_numbers<[1], [0], [0], [1], [0, 0, 1, 1], [], []>} : vector<8x4xf32>, vector<4x128xf32>, vector<8x128xf32> -> vector<8x128xf32>
    %c0_3 = arith.constant 0 : index
    %c0_4 = arith.constant 0 : index
    %3 = vector.load %arg3[%c0_3, %c0_4] : memref<1x128xf32, #tpu.memory_space<vmem>>, vector<1x128xf32>
    %4 = vector.broadcast %3 : vector<1x128xf32> to vector<8x128xf32>
    %5 = arith.addf %2, %4 : vector<8x128xf32>
    %6 = math.tanh %5 : vector<8x128xf32>
    %c0_5 = arith.constant 0 : index
    %c0_6 = arith.constant 0 : index
    %7 = vector.load %arg4[%c0_5, %c0_6] : memref<128x128xf32, #tpu.memory_space<vmem>>, vector<128x128xf32>
    %cst_7 = arith.constant dense<0.000000e+00> : vector<8x128xf32>
    %8 = tpu.matmul %6, %7, %cst_7 {dimension_numbers = #tpu.dot_dimension_numbers<[1], [0], [0], [1], [0, 0, 1, 1], [], []>} : vector<8x128xf32>, vector<128x128xf32>, vector<8x128xf32> -> vector<8x128xf32>
    %c0_8 = arith.constant 0 : index
    %c0_9 = arith.constant 0 : index
    %9 = vector.load %arg5[%c0_8, %c0_9] : memref<1x128xf32, #tpu.memory_space<vmem>>, vector<1x128xf32>
    %10 = vector.broadcast %9 : vector<1x128xf32> to vector<8x128xf32>
    %11 = arith.addf %8, %10 : vector<8x128xf32>
    %12 = math.tanh %11 : vector<8x128xf32>
    %c0_10 = arith.constant 0 : index
    %c0_11 = arith.constant 0 : index
    %13 = vector.load %arg6[%c0_10, %c0_11] : memref<128x128xf32, #tpu.memory_space<vmem>>, vector<128x128xf32>
    %cst_12 = arith.constant dense<0.000000e+00> : vector<8x128xf32>
    %14 = tpu.matmul %12, %13, %cst_12 {dimension_numbers = #tpu.dot_dimension_numbers<[1], [0], [0], [1], [0, 0, 1, 1], [], []>} : vector<8x128xf32>, vector<128x128xf32>, vector<8x128xf32> -> vector<8x128xf32>
    %c0_13 = arith.constant 0 : index
    %c0_14 = arith.constant 0 : index
    %15 = vector.load %arg7[%c0_13, %c0_14] : memref<1x128xf32, #tpu.memory_space<vmem>>, vector<1x128xf32>
    %16 = vector.broadcast %15 : vector<1x128xf32> to vector<8x128xf32>
    %17 = arith.addf %14, %16 : vector<8x128xf32>
    %c0_15 = arith.constant 0 : index
    %c0_16 = arith.constant 0 : index
    %18 = vector.load %arg8[%c0_15, %c0_16] : memref<8x128xf32, #tpu.memory_space<vmem>>, vector<8x128xf32>
    tpu.vector_store %arg8[%c0_15, %c0_16], %17 {strides = array<i32>} : memref<8x128xf32, #tpu.memory_space<vmem>>, vector<8x128xf32>,
    return
  }
  func.func @transform_0(%arg0: i32) -> (i32, i32) {
    %c0_i32 = arith.constant 0 : i32
    %c0_i32_0 = arith.constant 0 : i32
    return %arg0, %c0_i32 : i32, i32
  }
  func.func @transform_1(%arg0: i32) -> (i32, i32) {
    %c0_i32 = arith.constant 0 : i32
    %c0_i32_0 = arith.constant 0 : i32
    %c0_i32_1 = arith.constant 0 : i32
    return %c0_i32, %c0_i32_0 : i32, i32
  }
  func.func @transform_2(%arg0: i32) -> (i32, i32) {
    %c0_i32 = arith.constant 0 : i32
    %c0_i32_0 = arith.constant 0 : i32
    %c0_i32_1 = arith.constant 0 : i32
    return %c0_i32, %c0_i32_0 : i32, i32
  }
  func.func @transform_3(%arg0: i32) -> (i32, i32) {
    %c0_i32 = arith.constant 0 : i32
    %c0_i32_0 = arith.constant 0 : i32
    %c0_i32_1 = arith.constant 0 : i32
    return %c0_i32, %c0_i32_0 : i32, i32
  }
  func.func @transform_4(%arg0: i32) -> (i32, i32) {
    %c0_i32 = arith.constant 0 : i32
    %c0_i32_0 = arith.constant 0 : i32
    %c0_i32_1 = arith.constant 0 : i32
    return %c0_i32, %c0_i32_0 : i32, i32
  }
  func.func @transform_5(%arg0: i32) -> (i32, i32) {
    %c0_i32 = arith.constant 0 : i32
    %c0_i32_0 = arith.constant 0 : i32
    %c0_i32_1 = arith.constant 0 : i32
    return %c0_i32, %c0_i32_0 : i32, i32
  }
  func.func @transform_6(%arg0: i32) -> (i32, i32) {
    %c0_i32 = arith.constant 0 : i32
    %c0_i32_0 = arith.constant 0 : i32
    %c0_i32_1 = arith.constant 0 : i32
    return %c0_i32, %c0_i32_0 : i32, i32
  }
  func.func @transform_7(%arg0: i32) -> (i32, i32) {
    %c0_i32 = arith.constant 0 : i32
    %c0_i32_0 = arith.constant 0 : i32
    return %arg0, %c0_i32 : i32, i32
  }
}

module attributes {stable_mosaic.version = 11 : i64} {
  func.func @_ar_mlp_kernel(%arg0: i32, %arg1: memref<8x4xf32, #tpu.memory_space<vmem>>, %arg2: memref<4x128xf32, #tpu.memory_space<vmem>>, %arg3: memref<1x128xf32, #tpu.memory_space<vmem>>, %arg4: memref<128x128xf32, #tpu.memory_space<vmem>>, %arg5: memref<1x128xf32, #tpu.memory_space<vmem>>, %arg6: memref<128x128xf32, #tpu.memory_space<vmem>>, %arg7: memref<1x128xf32, #tpu.memory_space<vmem>>, %arg8: memref<8x128xf32, #tpu.memory_space<vmem>>) attributes {dimension_semantics = [#tpu.dimension_semantics<parallel>], iteration_bounds = array<i64: 1>, scalar_prefetch = 0 : i64, scratch_operands = 0 : i64, tpu.core_type = #tpu.core_type<tc>, window_params = [{transform_indices = @transform_0, window_bounds = array<i64: 8, 4>}, {pipeline_mode = #tpu.pipeline_mode<synchronous>, transform_indices = @transform_1, window_bounds = array<i64: 4, 128>}, {pipeline_mode = #tpu.pipeline_mode<synchronous>, transform_indices = @transform_2, window_bounds = array<i64: 1, 128>}, {pipeline_mode = #tpu.pipeline_mode<synchronous>, transform_indices = @transform_3, window_bounds = array<i64: 128, 128>}, {pipeline_mode = #tpu.pipeline_mode<synchronous>, transform_indices = @transform_4, window_bounds = array<i64: 1, 128>}, {pipeline_mode = #tpu.pipeline_mode<synchronous>, transform_indices = @transform_5, window_bounds = array<i64: 128, 128>}, {pipeline_mode = #tpu.pipeline_mode<synchronous>, transform_indices = @transform_6, window_bounds = array<i64: 1, 128>}, {transform_indices = @transform_7, window_bounds = array<i64: 8, 128>}]} {
    %c0 = arith.constant 0 : index
    %c0_0 = arith.constant 0 : index
    %0 = vector.load %arg1[%c0, %c0_0] : memref<8x4xf32, #tpu.memory_space<vmem>>, vector<8x4xf32>
    %c0_1 = arith.constant 0 : index
    %c0_2 = arith.constant 0 : index
    %1 = vector.load %arg2[%c0_1, %c0_2] : memref<4x128xf32, #tpu.memory_space<vmem>>, vector<4x128xf32>
    %cst = arith.constant dense<0.000000e+00> : vector<8x128xf32>
    %2 = tpu.matmul %0, %1, %cst {dimension_numbers = #tpu.dot_dimension_numbers<[1], [0], [0], [1], [0, 0, 1, 1], [], []>} : vector<8x4xf32>, vector<4x128xf32>, vector<8x128xf32> -> vector<8x128xf32>
    %c0_3 = arith.constant 0 : index
    %c0_4 = arith.constant 0 : index
    %3 = vector.load %arg3[%c0_3, %c0_4] : memref<1x128xf32, #tpu.memory_space<vmem>>, vector<1x128xf32>
    %4 = vector.broadcast %3 : vector<1x128xf32> to vector<8x128xf32>
    %5 = arith.addf %2, %4 : vector<8x128xf32>
    %6 = math.tanh %5 : vector<8x128xf32>
    %c0_5 = arith.constant 0 : index
    %c0_6 = arith.constant 0 : index
    %7 = vector.load %arg4[%c0_5, %c0_6] : memref<128x128xf32, #tpu.memory_space<vmem>>, vector<128x128xf32>
    %cst_7 = arith.constant dense<0.000000e+00> : vector<8x128xf32>
    %8 = tpu.matmul %6, %7, %cst_7 {dimension_numbers = #tpu.dot_dimension_numbers<[1], [0], [0], [1], [0, 0, 1, 1], [], []>} : vector<8x128xf32>, vector<128x128xf32>, vector<8x128xf32> -> vector<8x128xf32>
    %c0_8 = arith.constant 0 : index
    %c0_9 = arith.constant 0 : index
    %9 = vector.load %arg5[%c0_8, %c0_9] : memref<1x128xf32, #tpu.memory_space<vmem>>, vector<1x128xf32>
    %10 = vector.broadcast %9 : vector<1x128xf32> to vector<8x128xf32>
    %11 = arith.addf %8, %10 : vector<8x128xf32>
    %12 = math.tanh %11 : vector<8x128xf32>
    %c0_10 = arith.constant 0 : index
    %c0_11 = arith.constant 0 : index
    %13 = vector.load %arg6[%c0_10, %c0_11] : memref<128x128xf32, #tpu.memory_space<vmem>>, vector<128x128xf32>
    %cst_12 = arith.constant dense<0.000000e+00> : vector<8x128xf32>
    %14 = tpu.matmul %12, %13, %cst_12 {dimension_numbers = #tpu.dot_dimension_numbers<[1], [0], [0], [1], [0, 0, 1, 1], [], []>} : vector<8x128xf32>, vector<128x128xf32>, vector<8x128xf32> -> vector<8x128xf32>
    %c0_13 = arith.constant 0 : index
    %c0_14 = arith.constant 0 : index
    %15 = vector.load %arg7[%c0_13, %c0_14] : memref<1x128xf32, #tpu.memory_space<vmem>>, vector<1x128xf32>
    %16 = vector.broadcast %15 : vector<1x128xf32> to vector<8x128xf32>
    %17 = arith.addf %14, %16 : vector<8x128xf32>
    %c0_15 = arith.constant 0 : index
    %c0_16 = arith.constant 0 : index
    %18 = vector.load %arg8[%c0_15, %c0_16] : memref<8x128xf32, #tpu.memory_space<vmem>>, vector<8x128xf32>
    tpu.vector_store %arg8[%c0_15, %c0_16], %17 {strides = array<i32>} : memref<8x128xf32, #tpu.memory_space<vmem>>, vector<8x128xf32>,
    return
  }
  func.func @transform_0(%arg0: i32) -> (i32, i32) {
    %c0_i32 = arith.constant 0 : i32
    %c0_i32_0 = arith.constant 0 : i32
    return %arg0, %c0_i32 : i32, i32
  }
  func.func @transform_1(%arg0: i32) -> (i32, i32) {
    %c0_i32 = arith.constant 0 : i32
    %c0_i32_0 = arith.constant 0 : i32
    %c0_i32_1 = arith.constant 0 : i32
    return %c0_i32, %c0_i32_0 : i32, i32
  }
  func.func @transform_2(%arg0: i32) -> (i32, i32) {
    %c0_i32 = arith.constant 0 : i32
    %c0_i32_0 = arith.constant 0 : i32
    %c0_i32_1 = arith.constant 0 : i32
    return %c0_i32, %c0_i32_0 : i32, i32
  }
  func.func @transform_3(%arg0: i32) -> (i32, i32) {
    %c0_i32 = arith.constant 0 : i32
    %c0_i32_0 = arith.constant 0 : i32
    %c0_i32_1 = arith.constant 0 : i32
    return %c0_i32, %c0_i32_0 : i32, i32
  }
  func.func @transform_4(%arg0: i32) -> (i32, i32) {
    %c0_i32 = arith.constant 0 : i32
    %c0_i32_0 = arith.constant 0 : i32
    %c0_i32_1 = arith.constant 0 : i32
    return %c0_i32, %c0_i32_0 : i32, i32
  }
  func.func @transform_5(%arg0: i32) -> (i32, i32) {
    %c0_i32 = arith.constant 0 : i32
    %c0_i32_0 = arith.constant 0 : i32
    %c0_i32_1 = arith.constant 0 : i32
    return %c0_i32, %c0_i32_0 : i32, i32
  }
  func.func @transform_6(%arg0: i32) -> (i32, i32) {
    %c0_i32 = arith.constant 0 : i32
    %c0_i32_0 = arith.constant 0 : i32
    %c0_i32_1 = arith.constant 0 : i32
    return %c0_i32, %c0_i32_0 : i32, i32
  }
  func.func @transform_7(%arg0: i32) -> (i32, i32) {
    %c0_i32 = arith.constant 0 : i32
    %c0_i32_0 = arith.constant 0 : i32
    return %arg0, %c0_i32 : i32, i32
  }
}

</mosaic_0001>

<bundles_post_ra>
// kernel: tpu_custom_call.1
= control target key start
LH: loop header
LB: loop body
LE: loop exit
PB: predicated region body
PF: predicated region fallthrough
CT: control target
= control target key end

     0   :  { %12 = vsyncpa [#allocation3], 0  ;;  %s650_s0 = inlined_call_operand.vmem [shape: f32[8,4], index: 0, kind: input, shape index: {}]   ;;  %s651_s1 = inlined_call_operand.vmem [shape: f32[4,128], index: 1, kind: input, shape index: {}]   ;;  %s652_s2 = inlined_call_operand.vmem [shape: f32[1,128], index: 2, kind: input, shape index: {}]   ;;  %s653_s3 = inlined_call_operand.hbm [shape: f32[128,128], index: 3, kind: input, shape index: {}]   ;;  %s654_s4 = inlined_call_operand.vmem [shape: f32[1,128], index: 4, kind: input, shape index: {}]   ;;  %s655_s5 = inlined_call_operand.hbm [shape: f32[128,128], index: 5, kind: input, shape index: {}]   ;;  %s656_s6 = inlined_call_operand.vmem [shape: f32[1,128], index: 6, kind: input, shape index: {}]   ;;  %s657_s7 = inlined_call_operand.hbm [shape: f32[8,128], index: 7, kind: output, shape index: {}]  }
   0x1   :  { %13 = vsyncpa [#allocation6], 0 }
   0x2   :  { %14 = vsyncpa [#allocation4], 0  ;;  %s540_s24 = smov [#allocation2]  }
   0x3   :  { %s26_s25 = sshll.u32 %s540_s24, 4  ;;  %s27_s25 = int_to_ptr.vmem [resolvable:$true] %s26_s25 }
   0x4   :  { %s482_s26 = scalar_lea.vmem %s27_s25, 2048  ;;  %p487_p1 = scmp.lt.s32.totalorder %s27_s25, %s27_s25 }
   0x5   :  { %p483_p0 = scmp.ne.s32.totalorder %s27_s25, %s482_s26  ;;  %p488_p2 = scmp.lt.s32.totalorder %s482_s26, %s482_s26 }
   0x7   :  { %p489_p3 = por %p488_p2, %p487_p1 }
   0x9   :  { %p490_p4 = pnand %p489_p3, %p483_p0 }
   0xb   :  { %493 = shalt.err (!%p490_p4)
}
   0xc   :  { %s541_s27 = smov 128   ;;  %s542_s28 = smov 8  }
   0xd   :  { %32 = dma.hbm_to_vmem [thread:$0]  %s653_s3, 2048, %s27_s25, [#allocation3], %s541_s27, %s541_s27, %s542_s28  }
   0xe   :  { %s543_s8 = smov [#allocation5]  }
   0xf   :  { %s40_s9 = sshll.u32 %s543_s8, 4  ;;  %s41_s9 = int_to_ptr.vmem [resolvable:$true] %s40_s9 }
  0x10   :  { %s502_s10 = scalar_lea.vmem %s41_s9, 2048  ;;  %p507_p6 = scmp.lt.s32.totalorder %s41_s9, %s41_s9 }
  0x11   :  { %p503_p5 = scmp.ne.s32.totalorder %s41_s9, %s502_s10  ;;  %p508_p7 = scmp.lt.s32.totalorder %s502_s10, %s502_s10 }
  0x13   :  { %p509_p8 = por %p508_p7, %p507_p6 }
  0x15   :  { %p510_p9 = pnand %p509_p8, %p503_p5 }
  0x17   :  { %513 = shalt.err (!%p510_p9)
}
  0x18   :  { %46 = dma.hbm_to_vmem [thread:$0]  %s655_s5, 2048, %s41_s9, [#allocation6], %s541_s27, %s541_s27, %s542_s28  }
  0x19   :  { %534 = dma.done.wait [#allocation3], 2048  }
  0x1a   :  { %535 = vsyncadd [#allocation3], 4294965248 }
  0x1b   :  { %536 = dma.done.wait [#allocation6], 2048  }
  0x1c   :  { %537 = vsyncadd [#allocation6], 4294965248  ;;  %v544_v0 = vmov 0.0   ;;  %vm545_vm0 = vmmov 0   ;;  %vm68_vm1 = vcmask 1043456   ;;  %vm64_vm2 = vcmask 31744  }
  0x1d   :  { %388 = vmatprep.subr.mxu0 %v544_v0  ;;  %390 = vmatprep.mubr.msk.f32.mxu0 %vm545_vm0, %v544_v0  ;;  %v56_v1 = vld [vmem:[%s651_s1] sm:$0xf]  ;;  %v158_v3 = vld [vmem:[#allocation2 + $0x78] sm:$0xff]  ;;  %v157_v4 = vld [vmem:[#allocation2 + $0x70] sm:$0xff]  ;;  %s546_s18 = smov [#allocation7]  }
  0x1e   :  { %393 = vmatprep.subr.mxu1 %v544_v0  ;;  %425 = vmatprep.mubr.msk.f32.mxu1 %vm545_vm0, %v544_v0  ;;  %v55_v2 = vld [vmem:[%s650_s0] sm:$0xff]  ;;  %v156_v5 = vld [vmem:[#allocation2 + $0x68] sm:$0xff]  ;;  %v154_v7 = vld [vmem:[#allocation2 + $0x58] sm:$0xff]  ;;  %s337_s19 = sshll.u32 %s546_s18, 4  ;;  %s338_s19 = int_to_ptr.vmem [resolvable:$true] %s337_s19 }
  0x1f   :  { %389 = vmatpush3.msk.msra.mxu0 %vm68_vm1, %v56_v1  ;;  %394 = vmatpush3.msra.mxu1 %v158_v3  ;;  %v155_v6 = vld [vmem:[#allocation2 + $0x60] sm:$0xff]  ;;  %v153_v8 = vld [vmem:[#allocation2 + $0x50] sm:$0xff]  ;;  %v152_v9 = vld [vmem:[#allocation2 + $0x48] sm:$0xff]  ;;  %s514_s20 = scalar_lea.vmem %s338_s19, 128  ;;  %p519_p11 = scmp.lt.s32.totalorder %s338_s19, %s338_s19 }
  0x20   :  { %391 = vmatmul.mubr.msk.f32.vlgmr.msra.gmra.mxu0 %vm64_vm2, %v55_v2  ;;  %395 = vmatprep.subr.mxu1 %v544_v0  ;;  %v151_v10 = vld [vmem:[#allocation2 + $0x40] sm:$0xff]  ;;  %v150_v11 = vld [vmem:[#allocation2 + $0x38] sm:$0xff]  ;;  %v149_v12 = vld [vmem:[#allocation2 + $0x30] sm:$0xff]  ;;  %p515_p10 = scmp.ne.s32.totalorder %s338_s19, %s514_s20  ;;  %p520_p12 = scmp.lt.s32.totalorder %s514_s20, %s514_s20 }
  0x21   :  { %396 = vmatpush3.msra.mxu1 %v157_v4  ;;  %428 = vmatprep.subr.mxu0 %v544_v0  ;;  %v148_v13 = vld [vmem:[#allocation2 + $0x28] sm:$0xff]  ;;  %v147_v14 = vld [vmem:[#allocation2 + $0x20] sm:$0xff]  ;;  %v146_v15 = vld [vmem:[#allocation2 + $0x18] sm:$0xff] }
  0x22   :  { %397 = vmatprep.subr.mxu1 %v544_v0  ;;  %460 = vmatprep.mubr.msk.f32.mxu0 %vm545_vm0, %v544_v0  ;;  %v145_v16 = vld [vmem:[#allocation2 + $0x10] sm:$0xff]  ;;  %v144_v17 = vld [vmem:[#allocation2 + $0x8] sm:$0xff]  ;;  %v143_v18 = vld [vmem:[#allocation2] sm:$0xff]  ;;  %p521_p13 = por %p520_p12, %p519_p11 }
  0x23   :  { %398 = vmatpush3.msra.mxu1 %v156_v5  ;;  %v252_v19 = vld [vmem:[#allocation5 + $0x78] sm:$0xff]  ;;  %v251_v20 = vld [vmem:[#allocation5 + $0x70] sm:$0xff]  ;;  %v250_v21 = vld [vmem:[#allocation5 + $0x68] sm:$0xff] }
  0x24   :  { %399 = vmatprep.subr.mxu1 %v544_v0  ;;  %429 = vmatpush3.msra.mxu0 %v252_v19  ;;  %v249_v22 = vld [vmem:[#allocation5 + $0x60] sm:$0xff]  ;;  %v248_v23 = vld [vmem:[#allocation5 + $0x58] sm:$0xff]  ;;  %v247_v24 = vld [vmem:[#allocation5 + $0x50] sm:$0xff]  ;;  %p522_p0 = pnand %p521_p13, %p515_p10 }
  0x25   :  { %400 = vmatpush3.msra.mxu1 %v155_v6  ;;  %430 = vmatprep.subr.mxu0 %v544_v0  ;;  %v246_v25 = vld [vmem:[#allocation5 + $0x48] sm:$0xff]  ;;  %v347_v26 = vld [vmem:[%s652_s2] ss:$0 sm:$0xff]  ;;  %v244_v32 = vld [vmem:[#allocation5 + $0x38] sm:$0xff] }
  0x26   :  { %401 = vmatprep.subr.mxu1 %v544_v0  ;;  %431 = vmatpush3.msra.mxu0 %v251_v20  ;;  %v245_v31 = vld [vmem:[#allocation5 + $0x40] sm:$0xff]  ;;  %v243_v33 = vld [vmem:[#allocation5 + $0x30] sm:$0xff]  ;;  %v242_v34 = vld [vmem:[#allocation5 + $0x28] sm:$0xff] }
  0x27   :  { %402 = vmatpush3.msra.mxu1 %v154_v7  ;;  %432 = vmatprep.subr.mxu0 %v544_v0  ;;  %v241_v35 = vld [vmem:[#allocation5 + $0x20] sm:$0xff]  ;;  %v240_v36 = vld [vmem:[#allocation5 + $0x18] sm:$0xff]  ;;  %v239_v37 = vld [vmem:[#allocation5 + $0x10] sm:$0xff] }
  0x28   :  { %403 = vmatprep.subr.mxu1 %v544_v0  ;;  %433 = vmatpush3.msra.mxu0 %v250_v21  ;;  %v238_v38 = vld [vmem:[#allocation5 + $0x8] sm:$0xff]  ;;  %v237_v39 = vld [vmem:[#allocation5] sm:$0xff] }
  0x29   :  { %404 = vmatpush3.msra.mxu1 %v153_v8  ;;  %434 = vmatprep.subr.mxu0 %v544_v0  ;;  %v350_v40 = vld [vmem:[%s654_s4] ss:$0 sm:$0xff] }
  0x2a   :  { %405 = vmatprep.subr.mxu1 %v544_v0  ;;  %435 = vmatpush3.msra.mxu0 %v249_v22  ;;  %v351_v45 = vld [vmem:[%s656_s6] ss:$0 sm:$0xff] }
  0x2b   :  { %406 = vmatpush3.msra.mxu1 %v152_v9  ;;  %436 = vmatprep.subr.mxu0 %v544_v0 }
  0x2c   :  { %407 = vmatprep.subr.mxu1 %v544_v0  ;;  %437 = vmatpush3.msra.mxu0 %v248_v23 }
  0x2d   :  { %408 = vmatpush3.msra.mxu1 %v151_v10  ;;  %438 = vmatprep.subr.mxu0 %v544_v0 }
  0x2e   :  { %409 = vmatprep.subr.mxu1 %v544_v0  ;;  %439 = vmatpush3.msra.mxu0 %v247_v24 }
  0x2f   :  { %410 = vmatpush3.msra.mxu1 %v150_v11  ;;  %440 = vmatprep.subr.mxu0 %v544_v0 }
  0x30   :  { %411 = vmatprep.subr.mxu1 %v544_v0  ;;  %441 = vmatpush3.msra.mxu0 %v246_v25 }
  0x31   :  { %412 = vmatpush3.msra.mxu1 %v149_v12  ;;  %442 = vmatprep.subr.mxu0 %v544_v0 }
  0x32   :  { %413 = vmatprep.subr.mxu1 %v544_v0  ;;  %443 = vmatpush3.msra.mxu0 %v245_v31 }
  0x33   :  { %414 = vmatpush3.msra.mxu1 %v148_v13  ;;  %444 = vmatprep.subr.mxu0 %v544_v0 }
  0x34   :  { %415 = vmatprep.subr.mxu1 %v544_v0  ;;  %445 = vmatpush3.msra.mxu0 %v244_v32 }
  0x35   :  { %416 = vmatpush3.msra.mxu1 %v147_v14  ;;  %446 = vmatprep.subr.mxu0 %v544_v0 }
  0x36   :  { %417 = vmatprep.subr.mxu1 %v544_v0  ;;  %447 = vmatpush3.msra.mxu0 %v243_v33 }
  0x37   :  { %418 = vmatpush3.msra.mxu1 %v146_v15  ;;  %448 = vmatprep.subr.mxu0 %v544_v0 }
  0x38   :  { %419 = vmatprep.subr.mxu1 %v544_v0  ;;  %449 = vmatpush3.msra.mxu0 %v242_v34 }
  0x39   :  { %420 = vmatpush3.msra.mxu1 %v145_v16  ;;  %450 = vmatprep.subr.mxu0 %v544_v0 }
  0x3a   :  { %421 = vmatprep.subr.mxu1 %v544_v0  ;;  %451 = vmatpush3.msra.mxu0 %v241_v35 }
  0x3b   :  { %422 = vmatpush3.msra.mxu1 %v144_v17  ;;  %452 = vmatprep.subr.mxu0 %v544_v0 }
  0x3c   :  { %423 = vmatprep.subr.mxu1 %v544_v0  ;;  %453 = vmatpush3.msra.mxu0 %v240_v36 }
  0x3d   :  { %424 = vmatpush3.msra.mxu1 %v143_v18  ;;  %454 = vmatprep.subr.mxu0 %v544_v0 }
  0x3e   :  { %455 = vmatpush3.msra.mxu0 %v239_v37 }
  0x3f   :  { %456 = vmatprep.subr.mxu0 %v544_v0 }
  0x40   :  { %457 = vmatpush3.msra.mxu0 %v238_v38 }
  0x41   :  { %458 = vmatprep.subr.mxu0 %v544_v0 }
  0x42   :  { %459 = vmatpush3.msra.mxu0 %v237_v39 }
  0xe0   :  { %v138_v27 = vpop.f32.mrf.mxu0 }
  0xe1   :  { %v139_v28 = vadd.f32 %v347_v26, %v138_v27 }
  0xe2   :  { %v392_v29 = vpop.f32.mrf.mxu0 }
  0xe3   :  { %470 = vtanh.f32 %v139_v28 }
  0xf0   :  { %v471_v30 = vpop.eup %470 }
  0xf1   :  { %426 = vmatmul.mubr.f32.vlgmr.msra.gmra.mxu1 %v471_v30 }
 0x1b1   :  { %v232_v41 = vpop.f32.mrf.mxu1 }
 0x1b2   :  { %v233_v42 = vadd.f32 %v350_v40, %v232_v41 }
 0x1b3   :  { %v427_v43 = vpop.f32.mrf.mxu1 }
 0x1b4   :  { %472 = vtanh.f32 %v233_v42 }
 0x1c1   :  { %v473_v44 = vpop.eup %472 }
 0x1c2   :  { %461 = vmatmul.mubr.f32.vlgmr.msra.gmra.mxu0 %v473_v44 }
 0x282   :  { %v326_v46 = vpop.f32.mrf.mxu0 }
 0x283   :  { %v327_v47 = vadd.f32 %v351_v45, %v326_v46 }
 0x284   :  { %v462_v48 = vpop.f32.mrf.mxu0 }
 0x285   :  { %330 = vst [vmem:[#allocation7] sm:$0xff] %v327_v47 }
 0x286   :  { %525 = shalt.err (!%p522_p0)
}
 0x287   :  { %340 = dma.vmem_to_hbm [thread:$0]  %s338_s19, 128, %s657_s7, [#allocation4]  }
 0x288   :  { %538 = dma.done.wait [#allocation4], 128  }
 0x289   :  { %539 = vsyncadd [#allocation4], 4294967168 }
 0x28a   :  { %344 = vsyncpa [#allocation3], 1 }
 0x28b   :  { %345 = vsyncpa [#allocation6], 1 }
 0x28c   :  { %346 = vsyncpa [#allocation4], 1 }

// kernel: tpu_custom_call.1
= control target key start
LH: loop header
LB: loop body
LE: loop exit
PB: predicated region body
PF: predicated region fallthrough
CT: control target
= control target key end

     0   :  { %12 = vsyncpa [#allocation3], 0  ;;  %s650_s0 = inlined_call_operand.vmem [shape: f32[8,4], index: 0, kind: input, shape index: {}]   ;;  %s651_s1 = inlined_call_operand.vmem [shape: f32[4,128], index: 1, kind: input, shape index: {}]   ;;  %s652_s2 = inlined_call_operand.vmem [shape: f32[1,128], index: 2, kind: input, shape index: {}]   ;;  %s653_s3 = inlined_call_operand.hbm [shape: f32[128,128], index: 3, kind: input, shape index: {}]   ;;  %s654_s4 = inlined_call_operand.vmem [shape: f32[1,128], index: 4, kind: input, shape index: {}]   ;;  %s655_s5 = inlined_call_operand.hbm [shape: f32[128,128], index: 5, kind: input, shape index: {}]   ;;  %s656_s6 = inlined_call_operand.vmem [shape: f32[1,128], index: 6, kind: input, shape index: {}]   ;;  %s657_s7 = inlined_call_operand.hbm [shape: f32[8,128], index: 7, kind: output, shape index: {}]  }
   0x1   :  { %13 = vsyncpa [#allocation6], 0 }
   0x2   :  { %14 = vsyncpa [#allocation4], 0  ;;  %s540_s24 = smov [#allocation2]  }
   0x3   :  { %s26_s25 = sshll.u32 %s540_s24, 4  ;;  %s27_s25 = int_to_ptr.vmem [resolvable:$true] %s26_s25 }
   0x4   :  { %s482_s26 = scalar_lea.vmem %s27_s25, 2048  ;;  %p487_p1 = scmp.lt.s32.totalorder %s27_s25, %s27_s25 }
   0x5   :  { %p483_p0 = scmp.ne.s32.totalorder %s27_s25, %s482_s26  ;;  %p488_p2 = scmp.lt.s32.totalorder %s482_s26, %s482_s26 }
   0x7   :  { %p489_p3 = por %p488_p2, %p487_p1 }
   0x9   :  { %p490_p4 = pnand %p489_p3, %p483_p0 }
   0xb   :  { %493 = shalt.err (!%p490_p4)
}
   0xc   :  { %s541_s27 = smov 128   ;;  %s542_s28 = smov 8  }
   0xd   :  { %32 = dma.hbm_to_vmem [thread:$0]  %s653_s3, 2048, %s27_s25, [#allocation3], %s541_s27, %s541_s27, %s542_s28  }
   0xe   :  { %s543_s8 = smov [#allocation5]  }
   0xf   :  { %s40_s9 = sshll.u32 %s543_s8, 4  ;;  %s41_s9 = int_to_ptr.vmem [resolvable:$true] %s40_s9 }
  0x10   :  { %s502_s10 = scalar_lea.vmem %s41_s9, 2048  ;;  %p507_p6 = scmp.lt.s32.totalorder %s41_s9, %s41_s9 }
  0x11   :  { %p503_p5 = scmp.ne.s32.totalorder %s41_s9, %s502_s10  ;;  %p508_p7 = scmp.lt.s32.totalorder %s502_s10, %s502_s10 }
  0x13   :  { %p509_p8 = por %p508_p7, %p507_p6 }
  0x15   :  { %p510_p9 = pnand %p509_p8, %p503_p5 }
  0x17   :  { %513 = shalt.err (!%p510_p9)
}
  0x18   :  { %46 = dma.hbm_to_vmem [thread:$0]  %s655_s5, 2048, %s41_s9, [#allocation6], %s541_s27, %s541_s27, %s542_s28  }
  0x19   :  { %534 = dma.done.wait [#allocation3], 2048  }
  0x1a   :  { %535 = vsyncadd [#allocation3], 4294965248 }
  0x1b   :  { %536 = dma.done.wait [#allocation6], 2048  }
  0x1c   :  { %537 = vsyncadd [#allocation6], 4294965248  ;;  %v544_v0 = vmov 0.0   ;;  %vm545_vm0 = vmmov 0   ;;  %vm68_vm1 = vcmask 1043456   ;;  %vm64_vm2 = vcmask 31744  }
  0x1d   :  { %388 = vmatprep.subr.mxu0 %v544_v0  ;;  %390 = vmatprep.mubr.msk.f32.mxu0 %vm545_vm0, %v544_v0  ;;  %v56_v1 = vld [vmem:[%s651_s1] sm:$0xf]  ;;  %v158_v3 = vld [vmem:[#allocation2 + $0x78] sm:$0xff]  ;;  %v157_v4 = vld [vmem:[#allocation2 + $0x70] sm:$0xff]  ;;  %s546_s18 = smov [#allocation7]  }
  0x1e   :  { %393 = vmatprep.subr.mxu1 %v544_v0  ;;  %425 = vmatprep.mubr.msk.f32.mxu1 %vm545_vm0, %v544_v0  ;;  %v55_v2 = vld [vmem:[%s650_s0] sm:$0xff]  ;;  %v156_v5 = vld [vmem:[#allocation2 + $0x68] sm:$0xff]  ;;  %v154_v7 = vld [vmem:[#allocation2 + $0x58] sm:$0xff]  ;;  %s337_s19 = sshll.u32 %s546_s18, 4  ;;  %s338_s19 = int_to_ptr.vmem [resolvable:$true] %s337_s19 }
  0x1f   :  { %389 = vmatpush3.msk.msra.mxu0 %vm68_vm1, %v56_v1  ;;  %394 = vmatpush3.msra.mxu1 %v158_v3  ;;  %v155_v6 = vld [vmem:[#allocation2 + $0x60] sm:$0xff]  ;;  %v153_v8 = vld [vmem:[#allocation2 + $0x50] sm:$0xff]  ;;  %v152_v9 = vld [vmem:[#allocation2 + $0x48] sm:$0xff]  ;;  %s514_s20 = scalar_lea.vmem %s338_s19, 128  ;;  %p519_p11 = scmp.lt.s32.totalorder %s338_s19, %s338_s19 }
  0x20   :  { %391 = vmatmul.mubr.msk.f32.vlgmr.msra.gmra.mxu0 %vm64_vm2, %v55_v2  ;;  %395 = vmatprep.subr.mxu1 %v544_v0  ;;  %v151_v10 = vld [vmem:[#allocation2 + $0x40] sm:$0xff]  ;;  %v150_v11 = vld [vmem:[#allocation2 + $0x38] sm:$0xff]  ;;  %v149_v12 = vld [vmem:[#allocation2 + $0x30] sm:$0xff]  ;;  %p515_p10 = scmp.ne.s32.totalorder %s338_s19, %s514_s20  ;;  %p520_p12 = scmp.lt.s32.totalorder %s514_s20, %s514_s20 }
  0x21   :  { %396 = vmatpush3.msra.mxu1 %v157_v4  ;;  %428 = vmatprep.subr.mxu0 %v544_v0  ;;  %v148_v13 = vld [vmem:[#allocation2 + $0x28] sm:$0xff]  ;;  %v147_v14 = vld [vmem:[#allocation2 + $0x20] sm:$0xff]  ;;  %v146_v15 = vld [vmem:[#allocation2 + $0x18] sm:$0xff] }
  0x22   :  { %397 = vmatprep.subr.mxu1 %v544_v0  ;;  %460 = vmatprep.mubr.msk.f32.mxu0 %vm545_vm0, %v544_v0  ;;  %v145_v16 = vld [vmem:[#allocation2 + $0x10] sm:$0xff]  ;;  %v144_v17 = vld [vmem:[#allocation2 + $0x8] sm:$0xff]  ;;  %v143_v18 = vld [vmem:[#allocation2] sm:$0xff]  ;;  %p521_p13 = por %p520_p12, %p519_p11 }
  0x23   :  { %398 = vmatpush3.msra.mxu1 %v156_v5  ;;  %v252_v19 = vld [vmem:[#allocation5 + $0x78] sm:$0xff]  ;;  %v251_v20 = vld [vmem:[#allocation5 + $0x70] sm:$0xff]  ;;  %v250_v21 = vld [vmem:[#allocation5 + $0x68] sm:$0xff] }
  0x24   :  { %399 = vmatprep.subr.mxu1 %v544_v0  ;;  %429 = vmatpush3.msra.mxu0 %v252_v19  ;;  %v249_v22 = vld [vmem:[#allocation5 + $0x60] sm:$0xff]  ;;  %v248_v23 = vld [vmem:[#allocation5 + $0x58] sm:$0xff]  ;;  %v247_v24 = vld [vmem:[#allocation5 + $0x50] sm:$0xff]  ;;  %p522_p0 = pnand %p521_p13, %p515_p10 }
  0x25   :  { %400 = vmatpush3.msra.mxu1 %v155_v6  ;;  %430 = vmatprep.subr.mxu0 %v544_v0  ;;  %v246_v25 = vld [vmem:[#allocation5 + $0x48] sm:$0xff]  ;;  %v347_v26 = vld [vmem:[%s652_s2] ss:$0 sm:$0xff]  ;;  %v244_v32 = vld [vmem:[#allocation5 + $0x38] sm:$0xff] }
  0x26   :  { %401 = vmatprep.subr.mxu1 %v544_v0  ;;  %431 = vmatpush3.msra.mxu0 %v251_v20  ;;  %v245_v31 = vld [vmem:[#allocation5 + $0x40] sm:$0xff]  ;;  %v243_v33 = vld [vmem:[#allocation5 + $0x30] sm:$0xff]  ;;  %v242_v34 = vld [vmem:[#allocation5 + $0x28] sm:$0xff] }
  0x27   :  { %402 = vmatpush3.msra.mxu1 %v154_v7  ;;  %432 = vmatprep.subr.mxu0 %v544_v0  ;;  %v241_v35 = vld [vmem:[#allocation5 + $0x20] sm:$0xff]  ;;  %v240_v36 = vld [vmem:[#allocation5 + $0x18] sm:$0xff]  ;;  %v239_v37 = vld [vmem:[#allocation5 + $0x10] sm:$0xff] }
  0x28   :  { %403 = vmatprep.subr.mxu1 %v544_v0  ;;  %433 = vmatpush3.msra.mxu0 %v250_v21  ;;  %v238_v38 = vld [vmem:[#allocation5 + $0x8] sm:$0xff]  ;;  %v237_v39 = vld [vmem:[#allocation5] sm:$0xff] }
  0x29   :  { %404 = vmatpush3.msra.mxu1 %v153_v8  ;;  %434 = vmatprep.subr.mxu0 %v544_v0  ;;  %v350_v40 = vld [vmem:[%s654_s4] ss:$0 sm:$0xff] }
  0x2a   :  { %405 = vmatprep.subr.mxu1 %v544_v0  ;;  %435 = vmatpush3.msra.mxu0 %v249_v22  ;;  %v351_v45 = vld [vmem:[%s656_s6] ss:$0 sm:$0xff] }
  0x2b   :  { %406 = vmatpush3.msra.mxu1 %v152_v9  ;;  %436 = vmatprep.subr.mxu0 %v544_v0 }
  0x2c   :  { %407 = vmatprep.subr.mxu1 %v544_v0  ;;  %437 = vmatpush3.msra.mxu0 %v248_v23 }
  0x2d   :  { %408 = vmatpush3.msra.mxu1 %v151_v10  ;;  %438 = vmatprep.subr.mxu0 %v544_v0 }
  0x2e   :  { %409 = vmatprep.subr.mxu1 %v544_v0  ;;  %439 = vmatpush3.msra.mxu0 %v247_v24 }
  0x2f   :  { %410 = vmatpush3.msra.mxu1 %v150_v11  ;;  %440 = vmatprep.subr.mxu0 %v544_v0 }
  0x30   :  { %411 = vmatprep.subr.mxu1 %v544_v0  ;;  %441 = vmatpush3.msra.mxu0 %v246_v25 }
  0x31   :  { %412 = vmatpush3.msra.mxu1 %v149_v12  ;;  %442 = vmatprep.subr.mxu0 %v544_v0 }
  0x32   :  { %413 = vmatprep.subr.mxu1 %v544_v0  ;;  %443 = vmatpush3.msra.mxu0 %v245_v31 }
  0x33   :  { %414 = vmatpush3.msra.mxu1 %v148_v13  ;;  %444 = vmatprep.subr.mxu0 %v544_v0 }
  0x34   :  { %415 = vmatprep.subr.mxu1 %v544_v0  ;;  %445 = vmatpush3.msra.mxu0 %v244_v32 }
  0x35   :  { %416 = vmatpush3.msra.mxu1 %v147_v14  ;;  %446 = vmatprep.subr.mxu0 %v544_v0 }
  0x36   :  { %417 = vmatprep.subr.mxu1 %v544_v0  ;;  %447 = vmatpush3.msra.mxu0 %v243_v33 }
  0x37   :  { %418 = vmatpush3.msra.mxu1 %v146_v15  ;;  %448 = vmatprep.subr.mxu0 %v544_v0 }
  0x38   :  { %419 = vmatprep.subr.mxu1 %v544_v0  ;;  %449 = vmatpush3.msra.mxu0 %v242_v34 }
  0x39   :  { %420 = vmatpush3.msra.mxu1 %v145_v16  ;;  %450 = vmatprep.subr.mxu0 %v544_v0 }
  0x3a   :  { %421 = vmatprep.subr.mxu1 %v544_v0  ;;  %451 = vmatpush3.msra.mxu0 %v241_v35 }
  0x3b   :  { %422 = vmatpush3.msra.mxu1 %v144_v17  ;;  %452 = vmatprep.subr.mxu0 %v544_v0 }
  0x3c   :  { %423 = vmatprep.subr.mxu1 %v544_v0  ;;  %453 = vmatpush3.msra.mxu0 %v240_v36 }
  0x3d   :  { %424 = vmatpush3.msra.mxu1 %v143_v18  ;;  %454 = vmatprep.subr.mxu0 %v544_v0 }
  0x3e   :  { %455 = vmatpush3.msra.mxu0 %v239_v37 }
  0x3f   :  { %456 = vmatprep.subr.mxu0 %v544_v0 }
  0x40   :  { %457 = vmatpush3.msra.mxu0 %v238_v38 }
  0x41   :  { %458 = vmatprep.subr.mxu0 %v544_v0 }
  0x42   :  { %459 = vmatpush3.msra.mxu0 %v237_v39 }
  0xe0   :  { %v138_v27 = vpop.f32.mrf.mxu0 }
  0xe1   :  { %v139_v28 = vadd.f32 %v347_v26, %v138_v27 }
  0xe2   :  { %v392_v29 = vpop.f32.mrf.mxu0 }
  0xe3   :  { %470 = vtanh.f32 %v139_v28 }
  0xf0   :  { %v471_v30 = vpop.eup %470 }
  0xf1   :  { %426 = vmatmul.mubr.f32.vlgmr.msra.gmra.mxu1 %v471_v30 }
 0x1b1   :  { %v232_v41 = vpop.f32.mrf.mxu1 }
 0x1b2   :  { %v233_v42 = vadd.f32 %v350_v40, %v232_v41 }
 0x1b3   :  { %v427_v43 = vpop.f32.mrf.mxu1 }
 0x1b4   :  { %472 = vtanh.f32 %v233_v42 }
 0x1c1   :  { %v473_v44 = vpop.eup %472 }
 0x1c2   :  { %461 = vmatmul.mubr.f32.vlgmr.msra.gmra.mxu0 %v473_v44 }
 0x282   :  { %v326_v46 = vpop.f32.mrf.mxu0 }
 0x283   :  { %v327_v47 = vadd.f32 %v351_v45, %v326_v46 }
 0x284   :  { %v462_v48 = vpop.f32.mrf.mxu0 }
 0x285   :  { %330 = vst [vmem:[#allocation7] sm:$0xff] %v327_v47 }
 0x286   :  { %525 = shalt.err (!%p522_p0)
}
 0x287   :  { %340 = dma.vmem_to_hbm [thread:$0]  %s338_s19, 128, %s657_s7, [#allocation4]  }
 0x288   :  { %538 = dma.done.wait [#allocation4], 128  }
 0x289   :  { %539 = vsyncadd [#allocation4], 4294967168 }
 0x28a   :  { %344 = vsyncpa [#allocation3], 1 }
 0x28b   :  { %345 = vsyncpa [#allocation6], 1 }
 0x28c   :  { %346 = vsyncpa [#allocation4], 1 }

</bundles_post_ra>
